<compile_context>
chip_gen: v7x
topology: tpu7x:2x2x1
jax: 0.10.0
libtpu: 0.0.40
codegen_flags: <defaults>
</compile_context>

<pallas_src>
import math
from functools import partial

import jax
import jax.numpy as jnp
from jax.experimental import pallas as pl
from jax.experimental.pallas import tpu as pltpu


def _pma_kernel(qp_ref, x_ref,
                wlogit_ref, wv_ref, wo_ref, bo_ref, hmt_ref,
                o_ref,
                *, num_heads, dim_v, n_pad, n_valid, tb, num_seeds,
                approx_recip):
    f32 = jnp.float32
    D = dim_v
    H = num_heads
    rows = tb * n_pad

    X = x_ref[...]                                           # (rows, D) compute dtype

    # V projection: one large MXU matmul, f32 accumulation, no bias
    # (bv is folded into the residual in the wrapper since sum_k a == 1).
    V3 = jnp.dot(X, wv_ref[...],
                 preferred_element_type=f32).reshape(tb, n_pad, D)

    hmt = hmt_ref[...]                                       # (H, D) head indicator^T

    # Key-padding mask (seed-invariant); only built if N was padded.
    pad_mask = None
    if n_pad != n_valid:
        key_ids = jax.lax.broadcasted_iota(jnp.int32, (n_pad, H), 0)
        pad_mask = (key_ids < n_valid)[None, :, :]           # (1, n_pad, H)

    for s in range(num_seeds):                               # static; typically 1 seed
        # Per-head logits for every (batch, key) row via the folded weight:
        #   logits[r, h] = X[r, :] @ Wlogit[s][:, h]
        # (bk's contribution is constant over keys -> softmax-invariant, dropped)
        logits = jnp.dot(X, wlogit_ref[s], preferred_element_type=f32)  # (rows, H)
        logits3 = logits.reshape(tb, n_pad, H)
        if pad_mask is not None:
            logits3 = jnp.where(pad_mask, logits3, -1e30)

        # Softmax over keys (axis=1), statistics in f32.
        m = jnp.max(logits3, axis=1, keepdims=True)
        p = jnp.exp(logits3 - m)
        denom = jnp.sum(p, axis=1, keepdims=True)
        a = p * pl.reciprocal(denom, approx=approx_recip)    # (tb, n_pad, H)

        # a_full[r, d] = a[r, head(d)]  (head weights broadcast back onto lanes),
        # then contract over keys:  pv[b, d] = sum_k a_full[b, k, d] * V[b, k, d]
        a2 = a.reshape(rows, H).astype(hmt.dtype)
        a_full = jnp.dot(a2, hmt,
                         preferred_element_type=f32).reshape(tb, n_pad, D)
        pv = jnp.sum(a_full * V3, axis=1)                    # (tb, D) f32

        o = pv + qp_ref[s:s + 1, :]                          # residual: Q + bv
        # O = O + swish(fc_o(O))
        y = jnp.dot(o.astype(wo_ref.dtype), wo_ref[...],
                    preferred_element_type=f32) + bo_ref[...]
        o = o + y * jax.nn.sigmoid(y)
        o_ref[s] = o.astype(o_ref.dtype)                     # (tb, D) store


def pma_forward(X, params, *, num_heads, compute_dtype=jnp.bfloat16):
    """PMA forward.  X: (B, N, D) float32.  Returns (B, num_seeds, D)."""
    B, N, D = X.shape
    assert D % num_heads == 0, "dim must be divisible by num_heads"
    f32 = jnp.float32
    cdt = jnp.dtype(compute_dtype)

    S = params["S"].astype(f32)                              # (ns, D)
    ns = S.shape[0]
    ds = D // num_heads
    scale = 1.0 / math.sqrt(D)

    # ---- batch-invariant precompute (hoisted out of the per-batch grid) ----
    Q = S @ params["Wq"].astype(f32).T + params["bq"].astype(f32)      # (ns, D)

    head_of_lane = jnp.arange(D) // ds
    hm = (head_of_lane[:, None] == jnp.arange(num_heads)[None, :]).astype(f32)
    hmt = hm.T                                                         # (H, D)

    # Folded logit weight: Wlogit[s, e, h] = scale * sum_d Q[s,d] Wk[d,e] hm[d,h]
    Wk = params["Wk"].astype(f32)
    Wlogit = scale * jnp.einsum("sd,de,dh->seh", Q, Wk, hm)            # (ns, D, H)
    # Residual base with the value bias folded in (sum_k a == 1).
    Qp = Q + params["bv"].astype(f32)[None, :]                         # (ns, D)

    wv = params["Wv"].T.astype(cdt)                          # (in, out) layout
    wo = params["Wo"].T.astype(cdt)
    bo = params["bo"].reshape(1, D).astype(f32)
    wlogit = Wlogit.astype(cdt)
    hmt_c = hmt.astype(cdt)

    # ---- tiling: TB batch elements per grid step, N padded to sublane tiles ----
    n_pad = ((N + 7) // 8) * 8
    tb = max(1, 1024 // n_pad)                         # target ~1024 projection rows
    max_tb = max(1, (4 << 20) // (n_pad * D * cdt.itemsize))
    tb = min(tb, max_tb)
    if tb >= B:
        tb = B                                         # single grid step
    else:
        tb = max(8, (tb // 8) * 8)                     # keep (tb, D) blocks tile-legal
    b_pad = pl.cdiv(B, tb) * tb
    grid = (b_pad // tb,)

    Xp = jnp.zeros((b_pad, n_pad, D), dtype=cdt)
    Xp = Xp.at[:B, :N, :].set(X.astype(cdt))
    X2 = Xp.reshape(b_pad * n_pad, D)                  # lane-dense 2-D input rows

    kernel = partial(_pma_kernel, num_heads=num_heads, dim_v=D, n_pad=n_pad,
                     n_valid=N, tb=tb, num_seeds=ns,
                     approx_recip=(cdt != jnp.float32))

    const = lambda b: (0, 0)
    const3 = lambda b: (0, 0, 0)
    x_block = tb * n_pad

    # Rough per-step VMEM budget: double-buffered X/out + weights + f32 temps.
    x_bytes = x_block * D * cdt.itemsize
    w_bytes = (2 * D * D + (ns + 1) * num_heads * D) * cdt.itemsize
    o_bytes = ns * tb * D * X.dtype.itemsize
    interm = (3 * x_block * D + 2 * x_block * num_heads) * 4
    est = 2 * (x_bytes + o_bytes) + w_bytes + interm
    vmem_limit = int(min(48 << 20, max(32 << 20, 2 * est)))

    out = pl.pallas_call(
        kernel,
        out_shape=jax.ShapeDtypeStruct((ns, b_pad, D), X.dtype),
        grid_spec=pltpu.PrefetchScalarGridSpec(
            num_scalar_prefetch=0,
            grid=grid,
            in_specs=[
                pl.BlockSpec((ns, D), const),                    # Qp = Q + bv
                pl.BlockSpec((x_block, D), lambda b: (b, 0)),    # X rows of TB batches
                pl.BlockSpec((ns, D, num_heads), const3),        # folded logit weight
                pl.BlockSpec((D, D), const),                     # Wv^T
                pl.BlockSpec((D, D), const),                     # Wo^T
                pl.BlockSpec((1, D), const),                     # bo
                pl.BlockSpec((num_heads, D), const),             # head indicator^T
            ],
            out_specs=pl.BlockSpec((ns, tb, D), lambda b: (0, b, 0)),
        ),
        compiler_params=pltpu.CompilerParams(
            dimension_semantics=("parallel",),     # shards across v7x's 2 TensorCores
            vmem_limit_bytes=vmem_limit),
    )(Qp, X2, wlogit, wv, wo, bo, hmt_c)

    return jnp.transpose(out[:, :B, :], (1, 0, 2))     # (B, ns, D)


def pma_reference(X, params, *, num_heads):
    """Pure-JAX f32 reference matching the PyTorch MAB/PMA semantics."""
    B, N, D = X.shape
    S = jnp.broadcast_to(params["S"][None], (B,) + params["S"].shape)  # (B, ns, D)
    Q = S @ params["Wq"].T + params["bq"]
    K = X @ params["Wk"].T + params["bk"]
    V = X @ params["Wv"].T + params["bv"]
    split = lambda T: jnp.concatenate(jnp.split(T, num_heads, axis=2), axis=0)
    Q_, K_, V_ = split(Q), split(K), split(V)
    A = jax.nn.softmax(Q_ @ jnp.swapaxes(K_, 1, 2) / math.sqrt(D), axis=2)
    O = Q_ + A @ V_
    O = jnp.concatenate(jnp.split(O, num_heads, axis=0), axis=2)       # (B, ns, D)
    Y = O @ params["Wo"].T + params["bo"]
    return O + Y * jax.nn.sigmoid(Y)


def init_params(key, dim, num_seeds):
    ks = jax.random.split(key, 9)
    lim_s = math.sqrt(6.0 / (num_seeds + dim))       # xavier-uniform for seeds
    lim_l = 1.0 / math.sqrt(dim)                     # default nn.Linear init range
    u = lambda k, shape, lim: jax.random.uniform(k, shape, jnp.float32, -lim, lim)
    return {
        "S":  u(ks[0], (num_seeds, dim), lim_s),
        "Wq": u(ks[1], (dim, dim), lim_l), "bq": u(ks[2], (dim,), lim_l),
        "Wk": u(ks[3], (dim, dim), lim_l), "bk": u(ks[4], (dim,), lim_l),
        "Wv": u(ks[5], (dim, dim), lim_l), "bv": u(ks[6], (dim,), lim_l),
        "Wo": u(ks[7], (dim, dim), lim_l), "bo": u(ks[8], (dim,), lim_l),
    }


if __name__ == "__main__":
    # batch=4, set size=10 (exercises the N->16 padding/mask path), dim=32.
    B, N, D = 4, 10, 32
    num_heads, num_seeds = 4, 1

    key = jax.random.PRNGKey(0)
    kx, kp = jax.random.split(key)
    X = jax.random.normal(kx, (B, N, D), dtype=jnp.float32)
    params = init_params(kp, D, num_seeds)

    ref = pma_reference(X, params, num_heads=num_heads)

    # f32 compute path: tight check of the kernel math.
    out_f32 = jax.block_until_ready(
        pma_forward(X, params, num_heads=num_heads, compute_dtype=jnp.float32))
    assert out_f32.shape == (B, num_seeds, D)
    assert jnp.allclose(out_f32, ref, atol=2e-4, rtol=2e-4), "f32 mismatch vs reference"

    # bf16 MXU path (production configuration): bf16-appropriate tolerance.
    out_bf16 = jax.block_until_ready(
        pma_forward(X, params, num_heads=num_heads, compute_dtype=jnp.bfloat16))
    assert out_bf16.shape == (B, num_seeds, D)
    assert jnp.allclose(out_bf16, ref, atol=5e-2, rtol=5e-2), "bf16 mismatch vs reference"

    print("KERNEL_OK")
</pallas_src>

<mosaic_0001>
module attributes {stable_mosaic.version = 11 : i64} {
  func.func @_pma_kernel(%arg0: i32, %arg1: memref<1x32xf32, #tpu.memory_space<vmem>>, %arg2: memref<64x32xf32, #tpu.memory_space<vmem>>, %arg3: memref<1x32x4xf32, #tpu.memory_space<vmem>>, %arg4: memref<32x32xf32, #tpu.memory_space<vmem>>, %arg5: memref<32x32xf32, #tpu.memory_space<vmem>>, %arg6: memref<1x32xf32, #tpu.memory_space<vmem>>, %arg7: memref<4x32xf32, #tpu.memory_space<vmem>>, %arg8: memref<1x4x32xf32, #tpu.memory_space<vmem>>) attributes {dimension_semantics = [#tpu.dimension_semantics<parallel>], iteration_bounds = array<i64: 1>, scalar_prefetch = 0 : i64, scratch_operands = 0 : i64, tpu.core_type = #tpu.core_type<tc>, window_params = [{pipeline_mode = #tpu.pipeline_mode<synchronous>, transform_indices = @transform_0, window_bounds = array<i64: 1, 32>}, {transform_indices = @transform_1, window_bounds = array<i64: 64, 32>}, {pipeline_mode = #tpu.pipeline_mode<synchronous>, transform_indices = @transform_2, window_bounds = array<i64: 1, 32, 4>}, {pipeline_mode = #tpu.pipeline_mode<synchronous>, transform_indices = @transform_3, window_bounds = array<i64: 32, 32>}, {pipeline_mode = #tpu.pipeline_mode<synchronous>, transform_indices = @transform_4, window_bounds = array<i64: 32, 32>}, {pipeline_mode = #tpu.pipeline_mode<synchronous>, transform_indices = @transform_5, window_bounds = array<i64: 1, 32>}, {pipeline_mode = #tpu.pipeline_mode<synchronous>, transform_indices = @transform_6, window_bounds = array<i64: 4, 32>}, {transform_indices = @transform_7, window_bounds = array<i64: 1, 4, 32>}]} {
    %c0 = arith.constant 0 : index
    %c0_0 = arith.constant 0 : index
    %0 = vector.load %arg2[%c0, %c0_0] : memref<64x32xf32, #tpu.memory_space<vmem>>, vector<64x32xf32>
    %c0_1 = arith.constant 0 : index
    %c0_2 = arith.constant 0 : index
    %1 = vector.load %arg4[%c0_1, %c0_2] : memref<32x32xf32, #tpu.memory_space<vmem>>, vector<32x32xf32>
    %cst = arith.constant dense<0.000000e+00> : vector<64x32xf32>
    %2 = tpu.matmul %0, %1, %cst {dimension_numbers = #tpu.dot_dimension_numbers<[1], [0], [0], [1], [0, 0, 1, 1], [], []>} : vector<64x32xf32>, vector<32x32xf32>, vector<64x32xf32> -> vector<64x32xf32>
    %3 = vector.shape_cast %2 : vector<64x32xf32> to vector<4x16x32xf32>
    %c0_3 = arith.constant 0 : index
    %c0_4 = arith.constant 0 : index
    %4 = vector.load %arg7[%c0_3, %c0_4] : memref<4x32xf32, #tpu.memory_space<vmem>>, vector<4x32xf32>
    %5 = tpu.iota {dimensions = array<i32: 0>} : vector<16x4xi32>
    %c10_i32 = arith.constant 10 : i32
    %6 = vector.broadcast %c10_i32 : i32 to vector<16x4xi32>
    %7 = arith.cmpi slt, %5, %6 : vector<16x4xi32>
    %8 = vector.shape_cast %7 : vector<16x4xi1> to vector<1x16x4xi1>
    %c0_5 = arith.constant 0 : index
    %c0_6 = arith.constant 0 : index
    %c0_7 = arith.constant 0 : index
    %9 = vector.load %arg3[%c0_5, %c0_6, %c0_7] : memref<1x32x4xf32, #tpu.memory_space<vmem>>, vector<1x32x4xf32>
    %10 = vector.shape_cast %9 : vector<1x32x4xf32> to vector<32x4xf32>
    %cst_8 = arith.constant dense<0.000000e+00> : vector<64x4xf32>
    %11 = tpu.matmul %0, %10, %cst_8 {dimension_numbers = #tpu.dot_dimension_numbers<[1], [0], [0], [1], [0, 0, 1, 1], [], []>} : vector<64x32xf32>, vector<32x4xf32>, vector<64x4xf32> -> vector<64x4xf32>
    %12 = vector.shape_cast %11 : vector<64x4xf32> to vector<4x16x4xf32>
    %cst_9 = arith.constant -1.000000e+30 : f32
    %13 = vector.shape_cast %8 : vector<1x16x4xi1> to vector<1x16x4xi1>
    %14 = vector.broadcast %13 : vector<1x16x4xi1> to vector<4x16x4xi1>
    %15 = vector.broadcast %cst_9 : f32 to vector<4x16x4xf32>
    %16 = arith.select %14, %12, %15 : vector<4x16x4xi1>, vector<4x16x4xf32>
    %cst_10 = arith.constant dense<0xFF800000> : vector<4x4xf32>
    %17 = vector.multi_reduction <maximumf>, %16, %cst_10 [1] : vector<4x16x4xf32> to vector<4x4xf32>
    %18 = vector.shape_cast %17 : vector<4x4xf32> to vector<4x1x4xf32>
    %19 = vector.broadcast %18 : vector<4x1x4xf32> to vector<4x16x4xf32>
    %20 = arith.subf %16, %19 : vector<4x16x4xf32>
    %21 = math.exp %20 : vector<4x16x4xf32>
    %cst_11 = arith.constant dense<0.000000e+00> : vector<4x4xf32>
    %22 = vector.multi_reduction <add>, %21, %cst_11 [1] : vector<4x16x4xf32> to vector<4x4xf32>
    %23 = vector.shape_cast %22 : vector<4x4xf32> to vector<4x1x4xf32>
    %24 = tpu.reciprocal %23 : vector<4x1x4xf32> -> vector<4x1x4xf32>
    %25 = vector.broadcast %24 : vector<4x1x4xf32> to vector<4x16x4xf32>
    %26 = arith.mulf %21, %25 : vector<4x16x4xf32>
    %27 = vector.shape_cast %26 : vector<4x16x4xf32> to vector<64x4xf32>
    %cst_12 = arith.constant dense<0.000000e+00> : vector<64x32xf32>
    %28 = tpu.matmul %27, %4, %cst_12 {dimension_numbers = #tpu.dot_dimension_numbers<[1], [0], [0], [1], [0, 0, 1, 1], [], []>} : vector<64x4xf32>, vector<4x32xf32>, vector<64x32xf32> -> vector<64x32xf32>
    %29 = vector.shape_cast %28 : vector<64x32xf32> to vector<4x16x32xf32>
    %30 = arith.mulf %29, %3 : vector<4x16x32xf32>
    %cst_13 = arith.constant dense<0.000000e+00> : vector<4x32xf32>
    %31 = vector.multi_reduction <add>, %30, %cst_13 [1] : vector<4x16x32xf32> to vector<4x32xf32>
    %c0_14 = arith.constant 0 : index
    %c0_15 = arith.constant 0 : index
    %32 = vector.load %arg1[%c0_14, %c0_15] : memref<1x32xf32, #tpu.memory_space<vmem>>, vector<1x32xf32>
    %33 = vector.broadcast %32 : vector<1x32xf32> to vector<4x32xf32>
    %34 = arith.addf %31, %33 : vector<4x32xf32>
    %c0_16 = arith.constant 0 : index
    %c0_17 = arith.constant 0 : index
    %35 = vector.load %arg5[%c0_16, %c0_17] : memref<32x32xf32, #tpu.memory_space<vmem>>, vector<32x32xf32>
    %cst_18 = arith.constant dense<0.000000e+00> : vector<4x32xf32>
    %36 = tpu.matmul %34, %35, %cst_18 {dimension_numbers = #tpu.dot_dimension_numbers<[1], [0], [0], [1], [0, 0, 1, 1], [], []>} : vector<4x32xf32>, vector<32x32xf32>, vector<4x32xf32> -> vector<4x32xf32>
    %c0_19 = arith.constant 0 : index
    %c0_20 = arith.constant 0 : index
    %37 = vector.load %arg6[%c0_19, %c0_20] : memref<1x32xf32, #tpu.memory_space<vmem>>, vector<1x32xf32>
    %38 = vector.broadcast %37 : vector<1x32xf32> to vector<4x32xf32>
    %39 = arith.addf %36, %38 : vector<4x32xf32>
    %40 = arith.negf %39 : vector<4x32xf32>
    %41 = math.exp %40 : vector<4x32xf32>
    %cst_21 = arith.constant 1.000000e+00 : f32
    %42 = vector.broadcast %cst_21 : f32 to vector<4x32xf32>
    %43 = arith.addf %42, %41 : vector<4x32xf32>
    %44 = arith.divf %42, %43 : vector<4x32xf32>
    %45 = arith.mulf %39, %44 : vector<4x32xf32>
    %46 = arith.addf %34, %45 : vector<4x32xf32>
    %c0_22 = arith.constant 0 : index
    %c0_23 = arith.constant 0 : index
    %c0_24 = arith.constant 0 : index
    %47 = vector.load %arg8[%c0_22, %c0_23, %c0_24] : memref<1x4x32xf32, #tpu.memory_space<vmem>>, vector<1x4x32xf32>
    %48 = vector.shape_cast %47 : vector<1x4x32xf32> to vector<4x32xf32>
    %49 = vector.shape_cast %46 : vector<4x32xf32> to vector<1x4x32xf32>
    tpu.vector_store %arg8[%c0_22, %c0_23, %c0_24], %49 {strides = array<i32>} : memref<1x4x32xf32, #tpu.memory_space<vmem>>, vector<1x4x32xf32>,
    return
  }
  func.func @transform_0(%arg0: i32) -> (i32, i32) {
    %c0_i32 = arith.constant 0 : i32
    %c0_i32_0 = arith.constant 0 : i32
    %c0_i32_1 = arith.constant 0 : i32
    return %c0_i32, %c0_i32_0 : i32, i32
  }
  func.func @transform_1(%arg0: i32) -> (i32, i32) {
    %c0_i32 = arith.constant 0 : i32
    %c0_i32_0 = arith.constant 0 : i32
    return %arg0, %c0_i32 : i32, i32
  }
  func.func @transform_2(%arg0: i32) -> (i32, i32, i32) {
    %c0_i32 = arith.constant 0 : i32
    %c0_i32_0 = arith.constant 0 : i32
    %c0_i32_1 = arith.constant 0 : i32
    %c0_i32_2 = arith.constant 0 : i32
    return %c0_i32, %c0_i32_0, %c0_i32_1 : i32, i32, i32
  }
  func.func @transform_3(%arg0: i32) -> (i32, i32) {
    %c0_i32 = arith.constant 0 : i32
    %c0_i32_0 = arith.constant 0 : i32
    %c0_i32_1 = arith.constant 0 : i32
    return %c0_i32, %c0_i32_0 : i32, i32
  }
  func.func @transform_4(%arg0: i32) -> (i32, i32) {
    %c0_i32 = arith.constant 0 : i32
    %c0_i32_0 = arith.constant 0 : i32
    %c0_i32_1 = arith.constant 0 : i32
    return %c0_i32, %c0_i32_0 : i32, i32
  }
  func.func @transform_5(%arg0: i32) -> (i32, i32) {
    %c0_i32 = arith.constant 0 : i32
    %c0_i32_0 = arith.constant 0 : i32
    %c0_i32_1 = arith.constant 0 : i32
    return %c0_i32, %c0_i32_0 : i32, i32
  }
  func.func @transform_6(%arg0: i32) -> (i32, i32) {
    %c0_i32 = arith.constant 0 : i32
    %c0_i32_0 = arith.constant 0 : i32
    %c0_i32_1 = arith.constant 0 : i32
    return %c0_i32, %c0_i32_0 : i32, i32
  }
  func.func @transform_7(%arg0: i32) -> (i32, i32, i32) {
    %c0_i32 = arith.constant 0 : i32
    %c0_i32_0 = arith.constant 0 : i32
    %c0_i32_1 = arith.constant 0 : i32
    return %c0_i32, %arg0, %c0_i32_0 : i32, i32, i32
  }
}

</mosaic_0001>

<bundles_post_ra>
// kernel: tpu_custom_call.1
= control target key start
LH: loop header
LB: loop body
LE: loop exit
PB: predicated region body
PF: predicated region fallthrough
CT: control target
= control target key end

     0   :  { %vm39_vm0 = vcmask 261120   ;;  %s1129_s0 = inlined_call_operand.vmem [shape: f32[1,32], index: 0, kind: input, shape index: {}]   ;;  %s1130_s1 = inlined_call_operand.vmem [shape: f32[64,32], index: 1, kind: input, shape index: {}]   ;;  %s1131_s2 = inlined_call_operand.vmem [shape: f32[1,32,4], index: 2, kind: input, shape index: {}]   ;;  %s1132_s3 = inlined_call_operand.vmem [shape: f32[32,32], index: 3, kind: input, shape index: {}]   ;;  %s1133_s4 = inlined_call_operand.vmem [shape: f32[32,32], index: 4, kind: input, shape index: {}]   ;;  %s1134_s5 = inlined_call_operand.vmem [shape: f32[1,32], index: 5, kind: input, shape index: {}]   ;;  %s1135_s6 = inlined_call_operand.vmem [shape: f32[4,32], index: 6, kind: input, shape index: {}]   ;;  %s1136_s7 = inlined_call_operand.hbm [shape: f32[1,4,32], index: 7, kind: output, shape index: {}]  }
   0x1   :  { %v175_v0 = vld [vmem:[%s1131_s2] sm:$0xff]  ;;  %v176_v1 = vld [vmem:[%s1131_s2 + $0x8] sm:$0xff]  ;;  %v177_v2 = vld [vmem:[%s1131_s2 + $0x10] sm:$0xff] }
   0x2   :  { %v875_v3 = vpack.c.bf16 %v176_v1, %v175_v0  ;;  %v178_v4 = vld [vmem:[%s1131_s2 + $0x18] sm:$0xff]  ;;  %v27_v5 = vld [vmem:[%s1130_s1] sm:$0xff] }
   0x3   :  { %v879_v6 = vpack.c.bf16 %v178_v4, %v177_v2  ;;  %830 = vmatprep.mubr.msk.f32.mxu1 %vm39_vm0, %v27_v5  ;;  %810 = vmatprep.mubr.msk.f32.mxu0 %vm39_vm0, %v27_v5 }
   0x4   :  { %876 = vmatprep.subr.bf16.mxu1 %v875_v3 }
   0x5   :  { %878 = vmatpush3.bf16.msra.mxu1 %v875_v3 }
   0x6   :  { %12 = vsyncpa [#allocation3], 0  ;;  %880 = vmatprep.subr.bf16.mxu1 %v879_v6  ;;  %v28_v7 = vld [vmem:[%s1130_s1 + $0x8] sm:$0xff]  ;;  %v29_v8 = vld [vmem:[%s1130_s1 + $0x10] sm:$0xff]  ;;  %vm429_vm1 = vcmask 1043456   ;;  %v170_v21 = vlaneseq  ;;  %vm296_vm3 = vcmask 31744  }
   0x7   :  { %v30_v9 = vld [vmem:[%s1130_s1 + $0x18] sm:$0xff]  ;;  %v31_v10 = vld [vmem:[%s1130_s1 + $0x20] sm:$0xff]  ;;  %v32_v11 = vld [vmem:[%s1130_s1 + $0x28] sm:$0xff]  ;;  %vm946_vm4 = vmmov 0   ;;  %vm609_vm5 = vcmask 1041409   ;;  %vm612_vm6 = vcmask 1042434  }
   0x8   :  { %v33_v12 = vld [vmem:[%s1130_s1 + $0x30] sm:$0xff]  ;;  %v34_v13 = vld [vmem:[%s1130_s1 + $0x38] sm:$0xff]  ;;  %v35_v14 = vld [vmem:[%s1132_s3] sm:$0xff]  ;;  %v171_v22 = vshrl.u32 %v170_v21, 7  ;;  %vm615_vm7 = vcmask 1043459   ;;  %vm719_vm8 = vcmask 257024  }
   0x9   :  { %882 = vmatpush3.bf16.msra.mxu1 %v879_v6  ;;  %v36_v15 = vld [vmem:[%s1132_s3 + $0x8] sm:$0xff]  ;;  %v37_v17 = vld [vmem:[%s1132_s3 + $0x10] sm:$0xff]  ;;  %v38_v18 = vld [vmem:[%s1132_s3 + $0x18] sm:$0xff] }
   0xa   :  { %v867_v16 = vpack.c.bf16 %v36_v15, %v35_v14  ;;  %v871_v19 = vpack.c.bf16 %v38_v18, %v37_v17  ;;  %v169_v20 = vld [vmem:[%s1135_s6] sm:$0xf]  ;;  %v172_v23 = vadd.s32 8, %v171_v22 }
   0xc   :  { %831 = vmatmul.mubr.msk.f32.vlgmr.msra.gmra.mrb[0].mxu1 %vm39_vm0, %v28_v7  ;;  %868 = vmatprep.subr.bf16.mxu0 %v867_v16  ;;  %vm174_vm2 = vcmp.lt.s32.totalorder %v172_v23, 10 }
   0xd   :  { %833 = vmatprep.mubr.msk.f32.mxu1 %vm39_vm0, %v29_v8  ;;  %870 = vmatpush3.bf16.msra.mxu0 %v867_v16 }
   0xe   :  { %872 = vmatprep.subr.bf16.mxu0 %v871_v19 }
  0x10   :  { %834 = vmatmul.mubr.msk.f32.gmra.mrb[2].mxu1 %vm39_vm0, %v30_v9 }
  0x11   :  { %836 = vmatprep.mubr.msk.f32.mxu1 %vm39_vm0, %v31_v10  ;;  %874 = vmatpush3.bf16.msra.mxu0 %v871_v19 }
  0x12   :  { %842 = vmatprep.subr.msk.mxu0 %vm429_vm1, %v169_v20 }
  0x14   :  { %837 = vmatmul.mubr.msk.f32.gmra.mrb[4].mxu1 %vm39_vm0, %v32_v11  ;;  %811 = vmatmul.mubr.msk.f32.vlgmr.msra.gmra.mrb[0].mxu0 %vm39_vm0, %v28_v7 }
  0x15   :  { %839 = vmatprep.mubr.msk.f32.mxu1 %vm39_vm0, %v33_v12  ;;  %813 = vmatprep.mubr.msk.f32.mxu0 %vm39_vm0, %v29_v8 }
  0x16   :  { %843 = vmatpush3.msk.msra.mxu0 %vm429_vm1, %v169_v20 }
  0x18   :  { %840 = vmatmul.mubr.msk.f32.gmra.mrb[6].mxu1 %vm39_vm0, %v34_v13  ;;  %814 = vmatmul.mubr.msk.f32.gmra.mrb[2].mxu0 %vm39_vm0, %v30_v9 }
  0x19   :  { %816 = vmatprep.mubr.msk.f32.mxu0 %vm39_vm0, %v31_v10 }
  0x1c   :  { %817 = vmatmul.mubr.msk.f32.gmra.mrb[4].mxu0 %vm39_vm0, %v32_v11 }
  0x1d   :  { %819 = vmatprep.mubr.msk.f32.mxu0 %vm39_vm0, %v33_v12 }
  0x20   :  { %820 = vmatmul.mubr.msk.f32.gmra.mrb[6].mxu0 %vm39_vm0, %v34_v13 }
  0xdf   :  { %v832_v24 = vpop.f32.mrb[0].mxu1 }
  0xe0   :  { %v289_v25 = vsel %vm174_vm2, %v832_v24, -1e+30  ;;  %v245_v26 = vpop.f32.mrb[1].mxu1 }
  0xe1   :  { %v298_v27 = vsel %vm296_vm3, %v289_v25, -inf  ;;  %v297_v28 = vsel %vm296_vm3, %v245_v26, -inf }
  0xe2   :  { %v299_v29 = vmax.f32 %v297_v28, %v298_v27 }
  0xe3   :  { %v835_v30 = vpop.f32.mrb[2].mxu1 }
  0xe4   :  { %v300_v31 = vrot.slane %v299_v29, 4  ;;  %v291_v32 = vsel %vm174_vm2, %v835_v30, -1e+30  ;;  %v255_v33 = vpop.f32.mrb[3].mxu1 }
  0xe5   :  { %v307_v34 = vsel %vm296_vm3, %v291_v32, -inf  ;;  %v306_v35 = vsel %vm296_vm3, %v255_v33, -inf }
  0xe6   :  { %v301_v36 = vmax.f32 %v299_v29, %v300_v31  ;;  %v308_v37 = vmax.f32 %v306_v35, %v307_v34 }
  0xe7   :  { %v838_v38 = vpop.f32.mrb[4].mxu1 }
  0xe8   :  { %v302_v39 = vrot.slane %v301_v36, 2  ;;  %v309_v40 = vrot.slane %v308_v37, 4  ;;  %v293_v41 = vsel %vm174_vm2, %v838_v38, -1e+30  ;;  %v265_v42 = vpop.f32.mrb[5].mxu1 }
  0xe9   :  { %v316_v43 = vsel %vm296_vm3, %v293_v41, -inf  ;;  %v315_v44 = vsel %vm296_vm3, %v265_v42, -inf }
  0xea   :  { %v303_v45 = vmax.f32 %v301_v36, %v302_v39  ;;  %v310_v46 = vmax.f32 %v308_v37, %v309_v40  ;;  %v317_v47 = vmax.f32 %v315_v44, %v316_v43 }
  0xeb   :  { %v841_v48 = vpop.f32.mrb[6].mxu1 }
  0xec   :  { %v304_v49 = vrot.slane %v303_v45, 1  ;;  %v311_v50 = vrot.slane %v310_v46, 2  ;;  %v318_v51 = vrot.slane %v317_v47, 4  ;;  %v295_v52 = vsel %vm174_vm2, %v841_v48, -1e+30  ;;  %v275_v53 = vpop.f32.mrb[7].mxu1 }
  0xed   :  { %v325_v54 = vsel %vm296_vm3, %v295_v52, -inf  ;;  %v324_v55 = vsel %vm296_vm3, %v275_v53, -inf }
  0xee   :  { %v305_v56 = vmax.f32 %v303_v45, %v304_v49  ;;  %v312_v57 = vmax.f32 %v310_v46, %v311_v50  ;;  %v319_v58 = vmax.f32 %v317_v47, %v318_v51  ;;  %v326_v59 = vmax.f32 %v324_v55, %v325_v54 }
  0xf0   :  { %v333_v60 = vsub.f32 %v245_v26, %v305_v56  ;;  %v334_v61 = vsub.f32 %v289_v25, %v305_v56  ;;  %v313_v62 = vrot.slane %v312_v57, 1  ;;  %v320_v63 = vrot.slane %v319_v58, 2 }
  0xf1   :  { %v327_v0 = vrot.slane %v326_v59, 4 }
  0xf2   :  { %v341_v1 = vmul.f32 1.442695, %v333_v60  ;;  %v343_v2 = vmul.f32 1.442695, %v334_v61  ;;  %v314_v3 = vmax.f32 %v312_v57, %v313_v62  ;;  %v321_v4 = vmax.f32 %v319_v58, %v320_v63 }
  0xf3   :  { %v328_v5 = vmax.f32 %v326_v59, %v327_v0 }
  0xf4   :  { %893 = vpow2.f32 %v341_v1  ;;  %v335_v6 = vsub.f32 %v255_v33, %v314_v3  ;;  %v336_v7 = vsub.f32 %v291_v32, %v314_v3  ;;  %v322_v8 = vrot.slane %v321_v4, 1 }
  0xf5   :  { %895 = vpow2.f32 %v343_v2  ;;  %v329_v9 = vrot.slane %v328_v5, 2 }
  0xf6   :  { %v345_v10 = vmul.f32 1.442695, %v335_v6  ;;  %v347_v11 = vmul.f32 1.442695, %v336_v7  ;;  %v323_v12 = vmax.f32 %v321_v4, %v322_v8 }
  0xf7   :  { %v330_v13 = vmax.f32 %v328_v5, %v329_v9 }
  0xf8   :  { %897 = vpow2.f32 %v345_v10  ;;  %v337_v14 = vsub.f32 %v265_v42, %v323_v12  ;;  %v338_v15 = vsub.f32 %v293_v41, %v323_v12 }
  0xf9   :  { %899 = vpow2.f32 %v347_v11  ;;  %v331_v16 = vrot.slane %v330_v13, 1 }
  0xfa   :  { %v349_v17 = vmul.f32 1.442695, %v337_v14  ;;  %v351_v18 = vmul.f32 1.442695, %v338_v15 }
  0xfb   :  { %v332_v19 = vmax.f32 %v330_v13, %v331_v16  ;;  %v812_v16 = vpop.f32.mrb[0].mxu0 }
  0xfc   :  { %901 = vpow2.f32 %v349_v17  ;;  %v130_v17 = vpop.f32.mrb[1].mxu0 }
  0xfd   :  { %903 = vpow2.f32 %v351_v18  ;;  %v339_v20 = vsub.f32 %v275_v53, %v332_v19  ;;  %v340_v21 = vsub.f32 %v295_v52, %v332_v19  ;;  %v815_v18 = vpop.f32.mrb[2].mxu0 }
  0xfe   :  { %v894_v22 = vpop.eup %893  ;;  %v140_v19 = vpop.f32.mrb[3].mxu0 }
  0xff   :  { %v896_v23 = vpop.eup %895  ;;  %v357_v24 = vsel %vm296_vm3, %v894_v22, 0.0  ;;  %v353_v25 = vmul.f32 1.442695, %v339_v20  ;;  %v355_v26 = vmul.f32 1.442695, %v340_v21  ;;  %v818_v20 = vpop.f32.mrb[4].mxu0 }
 0x100   :  { %v358_v27 = vsel %vm296_vm3, %v896_v23, 0.0  ;;  %v150_v21 = vpop.f32.mrb[5].mxu0 }
 0x101   :  { %v359_v28 = vadd.f32 %v358_v27, %v357_v24  ;;  %905 = vpow2.f32 %v353_v25  ;;  %v593_v24 = vld [vmem:[%s1133_s4] sm:$0xff]  ;;  %v594_v25 = vld [vmem:[%s1133_s4 + $0x8] sm:$0xff]  ;;  %v945_v27 = vmov 0.0|0.0  }
 0x102   :  { %v898_v29 = vpop.eup %897  ;;  %907 = vpow2.f32 %v355_v26  ;;  %v884_v26 = vpack.c.bf16 %v594_v25, %v593_v24  ;;  %883 = vmatprep.subr.bf16.mxu1 %v945_v27 }
 0x103   :  { %v900_v30 = vpop.eup %899  ;;  %v360_v31 = vrot.slane %v359_v28, 4  ;;  %v366_v32 = vsel %vm296_vm3, %v898_v29, 0.0 }
 0x104   :  { %v367_v33 = vsel %vm296_vm3, %v900_v30, 0.0  ;;  %885 = vmatpush3.bf16.msra.mxu1 %v884_v26 }
 0x105   :  { %v361_v34 = vadd.f32 %v360_v31, %v359_v28  ;;  %v368_v35 = vadd.f32 %v367_v33, %v366_v32  ;;  %886 = vmatprep.subr.bf16.mxu1 %v945_v27  ;;  %v595_v28 = vld [vmem:[%s1133_s4 + $0x10] sm:$0xff]  ;;  %v947_v31 = vmov 0.0  }
 0x106   :  { %v902_v36 = vpop.eup %901  ;;  %864 = vmatprep.mubr.msk.f32.mxu1 %vm946_vm4, %v947_v31  ;;  %v761_v31 = vld [vmem:[%s1134_s5] ss:$0 sm:$0xff]  ;;  %s948_s5 = smov [#allocation2]  }
 0x107   :  { %v904_v37 = vpop.eup %903  ;;  %v362_v38 = vrot.slane %v361_v34, 2  ;;  %v369_v39 = vrot.slane %v368_v35, 4  ;;  %v375_v40 = vsel %vm296_vm3, %v902_v36, 0.0  ;;  %s727_s17 = sshll.u32 %s948_s5, 4  ;;  %s728_s17 = int_to_ptr.vmem [resolvable:$true] %s727_s17 }
 0x108   :  { %v376_v41 = vsel %vm296_vm3, %v904_v37, 0.0  ;;  %s921_s18 = scalar_lea.vmem %s728_s17, 64  ;;  %p926_p1 = scmp.lt.s32.totalorder %s728_s17, %s728_s17 }
 0x109   :  { %v363_v42 = vadd.f32 %v362_v38, %v361_v34  ;;  %v370_v43 = vadd.f32 %v369_v39, %v368_v35  ;;  %v377_v44 = vadd.f32 %v376_v41, %v375_v40  ;;  %p922_p0 = scmp.ne.s32.totalorder %s728_s17, %s921_s18  ;;  %p927_p2 = scmp.lt.s32.totalorder %s921_s18, %s921_s18 }
 0x10b   :  { %v906_v45 = vpop.eup %905  ;;  %v364_v46 = vrot.slane %v363_v42, 1  ;;  %v371_v47 = vrot.slane %v370_v43, 2  ;;  %v378_v48 = vrot.slane %v377_v44, 4  ;;  %p928_p3 = por %p927_p2, %p926_p1 }
 0x10c   :  { %v908_v49 = vpop.eup %907  ;;  %v384_v50 = vsel %vm296_vm3, %v906_v45, 0.0 }
 0x10d   :  { %v372_v51 = vadd.f32 %v371_v47, %v370_v43  ;;  %v379_v52 = vadd.f32 %v378_v48, %v377_v44  ;;  %v385_v53 = vsel %vm296_vm3, %v908_v49, 0.0  ;;  %v365_v54 = vadd.f32 %v364_v46, %v363_v42  ;;  %p929_p4 = pnand %p928_p3, %p922_p0 }
 0x10e   :  { %v386_v55 = vadd.f32 %v385_v53, %v384_v50 }
 0x10f   :  { %v373_v56 = vrot.slane %v372_v51, 1  ;;  %v380_v57 = vrot.slane %v379_v52, 2  ;;  %909 = vrcp.f32 %v365_v54 }
 0x110   :  { %v387_v58 = vrot.slane %v386_v55, 4 }
 0x111   :  { %v381_v59 = vadd.f32 %v380_v57, %v379_v52  ;;  %v374_v60 = vadd.f32 %v373_v56, %v372_v51 }
 0x112   :  { %v388_v61 = vadd.f32 %v387_v58, %v386_v55 }
 0x113   :  { %v382_v62 = vrot.slane %v381_v59, 1  ;;  %911 = vrcp.f32 %v374_v60 }
 0x114   :  { %v389_v63 = vrot.slane %v388_v61, 2 }
 0x115   :  { %v383_v0 = vadd.f32 %v382_v62, %v381_v59 }
 0x116   :  { %v390_v1 = vadd.f32 %v389_v63, %v388_v61 }
 0x117   :  { %913 = vrcp.f32 %v383_v0 }
 0x118   :  { %v391_v2 = vrot.slane %v390_v1, 1 }
 0x119   :  { %v910_v3 = vpop.eup %909 }
 0x11a   :  { %v397_v4 = vmul.f32 %v910_v3, %v894_v22  ;;  %v398_v5 = vmul.f32 %v910_v3, %v896_v23  ;;  %v392_v6 = vadd.f32 %v391_v2, %v390_v1  ;;  %v821_v22 = vpop.f32.mrb[6].mxu0 }
 0x11b   :  { %v160_v23 = vpop.f32.mrb[7].mxu0 }
 0x11c   :  { %844 = vmatprep.mubr.msk.f32.mxu0 %vm296_vm3, %v397_v4  ;;  %915 = vrcp.f32 %v392_v6 }
 0x11d   :  { %v912_v7 = vpop.eup %911  ;;  %845 = vmatmul.mubr.msk.f32.vlgmr.msra.gmra.mrb[8].mxu0 %vm296_vm3, %v398_v5 }
 0x11e   :  { %v399_v8 = vmul.f32 %v912_v7, %v898_v29  ;;  %v400_v9 = vmul.f32 %v912_v7, %v900_v30  ;;  %v596_v29 = vld [vmem:[%s1133_s4 + $0x18] sm:$0xff] }
 0x11f   :  { %v887_v30 = vpack.c.bf16 %v596_v29, %v595_v28 }
 0x120   :  { %847 = vmatprep.mubr.msk.f32.mxu0 %vm296_vm3, %v399_v8 }
 0x121   :  { %v914_v10 = vpop.eup %913  ;;  %848 = vmatmul.mubr.msk.f32.gmra.mrb[10].mxu0 %vm296_vm3, %v400_v9  ;;  %888 = vmatpush3.bf16.msra.mxu1 %v887_v30 }
 0x122   :  { %v401_v11 = vmul.f32 %v914_v10, %v902_v36  ;;  %v402_v12 = vmul.f32 %v914_v10, %v904_v37 }
 0x124   :  { %850 = vmatprep.mubr.msk.f32.mxu0 %vm296_vm3, %v401_v11 }
 0x125   :  { %851 = vmatmul.mubr.msk.f32.gmra.mrb[12].mxu0 %vm296_vm3, %v402_v12 }
 0x126   :  { %v916_v13 = vpop.eup %915 }
 0x127   :  { %v403_v14 = vmul.f32 %v916_v13, %v906_v45  ;;  %v404_v15 = vmul.f32 %v916_v13, %v908_v49 }
 0x129   :  { %853 = vmatprep.mubr.msk.f32.mxu0 %vm296_vm3, %v403_v14 }
 0x12a   :  { %854 = vmatmul.mubr.msk.f32.gmra.mrb[14].mxu0 %vm296_vm3, %v404_v15  ;;  %v760_v15 = vld [vmem:[%s1129_s0] ss:$0 sm:$0xff] }
 0x1f0   :  { %v846_v32 = vpop.f32.mrb[8].mxu0 }
 0x1f1   :  { %v539_v33 = vmul.f32 %v846_v32, %v812_v16  ;;  %v499_v34 = vpop.f32.mrb[9].mxu0 }
 0x1f2   :  { %v538_v35 = vmul.f32 %v499_v34, %v130_v17 }
 0x1f3   :  { %v547_v36 = vsel %vm39_vm0, %v539_v33, 0.0 }
 0x1f4   :  { %v546_v37 = vsel %vm39_vm0, %v538_v35, 0.0  ;;  %v849_v38 = vpop.f32.mrb[10].mxu0 }
 0x1f5   :  { %v548_v39 = vadd.f32 %v547_v36, %v546_v37  ;;  %v541_v40 = vmul.f32 %v849_v38, %v815_v18  ;;  %v509_v41 = vpop.f32.mrb[11].mxu0 }
 0x1f6   :  { %v540_v42 = vmul.f32 %v509_v41, %v140_v19 }
 0x1f7   :  { %v556_v43 = vsel %vm39_vm0, %v541_v40, 0.0  ;;  %v549_v44 = vrot.slane %v548_v39, 4 }
 0x1f8   :  { %v555_v45 = vsel %vm39_vm0, %v540_v42, 0.0  ;;  %v852_v46 = vpop.f32.mrb[12].mxu0 }
 0x1f9   :  { %v557_v47 = vadd.f32 %v556_v43, %v555_v45  ;;  %v543_v48 = vmul.f32 %v852_v46, %v818_v20  ;;  %v519_v49 = vpop.f32.mrb[13].mxu0  ;;  %v550_v53 = vadd.f32 %v549_v44, %v548_v39 }
 0x1fa   :  { %v542_v50 = vmul.f32 %v519_v49, %v150_v21 }
 0x1fb   :  { %v558_v51 = vrot.slane %v557_v47, 4  ;;  %v565_v52 = vsel %vm39_vm0, %v543_v48, 0.0  ;;  %v551_v63 = vrot.slane %v550_v53, 2 }
 0x1fc   :  { %v564_v54 = vsel %vm39_vm0, %v542_v50, 0.0 }
 0x1fd   :  { %v559_v55 = vadd.f32 %v558_v51, %v557_v47  ;;  %v566_v56 = vadd.f32 %v565_v52, %v564_v54  ;;  %v855_v57 = vpop.f32.mrb[14].mxu0  ;;  %v552_v7 = vadd.f32 %v551_v63, %v550_v53 }
 0x1fe   :  { %v545_v58 = vmul.f32 %v855_v57, %v821_v22  ;;  %v529_v59 = vpop.f32.mrb[15].mxu0 }
 0x1ff   :  { %v560_v60 = vrot.slane %v559_v55, 2  ;;  %v567_v61 = vrot.slane %v566_v56, 4  ;;  %v544_v62 = vmul.f32 %v529_v59, %v160_v23  ;;  %v553_v13 = vrot.slane %v552_v7, 1 }
 0x200   :  { %v574_v0 = vsel %vm39_vm0, %v545_v58, 0.0 }
 0x201   :  { %v561_v1 = vadd.f32 %v560_v60, %v559_v55  ;;  %v568_v2 = vadd.f32 %v567_v61, %v566_v56  ;;  %v573_v3 = vsel %vm39_vm0, %v544_v62, 0.0  ;;  %v554_v20 = vadd.f32 %v553_v13, %v552_v7 }
 0x202   :  { %v575_v4 = vadd.f32 %v574_v0, %v573_v3 }
 0x203   :  { %v562_v5 = vrot.slane %v561_v1, 1  ;;  %v569_v6 = vrot.slane %v568_v2, 2  ;;  %v589_v25 = vadd.f32 %v760_v15, %v554_v20 }
 0x204   :  { %v576_v8 = vrot.slane %v575_v4, 4 }
 0x205   :  { %v570_v9 = vadd.f32 %v569_v6, %v568_v2  ;;  %v563_v10 = vadd.f32 %v562_v5, %v561_v1 }
 0x206   :  { %v577_v11 = vadd.f32 %v576_v8, %v575_v4 }
 0x207   :  { %v571_v12 = vrot.slane %v570_v9, 1  ;;  %v590_v17 = vadd.f32 %v760_v15, %v563_v10 }
 0x208   :  { %v578_v14 = vrot.slane %v577_v11, 2 }
 0x209   :  { %v572_v16 = vadd.f32 %v571_v12, %v570_v9  ;;  %v608_v22 = vrot.slane %v590_v17, 7 }
 0x20a   :  { %v579_v18 = vadd.f32 %v578_v14, %v577_v11 }
 0x20b   :  { %v591_v19 = vadd.f32 %v760_v15, %v572_v16  ;;  %v610_v27 = vsel %vm609_vm5, %v608_v22, %v589_v25 }
 0x20c   :  { %v580_v21 = vrot.slane %v579_v18, 1 }
 0x20d   :  { %v611_v24 = vrot.slane %v591_v19, 6 }
 0x20e   :  { %v581_v23 = vadd.f32 %v580_v21, %v579_v18 }
 0x20f   :  { %v613_v29 = vsel %vm612_vm6, %v611_v24, %v610_v27 }
 0x210   :  { %v592_v26 = vadd.f32 %v760_v15, %v581_v23 }
 0x212   :  { %v614_v28 = vrot.slane %v592_v26, 5 }
 0x214   :  { %v616_v30 = vsel %vm615_vm7, %v614_v28, %v613_v29 }
 0x215   :  { %865 = vmatmul.mubr.msk.f32.vlgmr.msra.gmra.mrb[8].mxu1 %vm39_vm0, %v616_v30 }
 0x2e8   :  { %v685_v32 = vpop.f32.mrb[8].mxu1 }
 0x2e9   :  { %v686_v33 = vadd.f32 %v761_v31, %v685_v32  ;;  %v866_v34 = vpop.f32.mrb[9].mxu1 }
 0x2eb   :  { %v763_v35 = vmul.f32 -1.442695, %v686_v33 }
 0x2ed   :  { %917 = vpow2.f32 %v763_v35 }
 0x2f7   :  { %v918_v36 = vpop.eup %917 }
 0x2f8   :  { %v692_v37 = vadd.f32 1.0, %v918_v36 }
 0x2fa   :  { %919 = vrcp.f32 %v692_v37 }
 0x304   :  { %v920_v38 = vpop.eup %919 }
 0x305   :  { %v695_v39 = vmul.f32 %v920_v38, %v686_v33 }
 0x307   :  { %v697_v40 = vrot.slane %v695_v39, 1  ;;  %v698_v41 = vrot.slane %v695_v39, 2  ;;  %v699_v42 = vrot.slane %v695_v39, 3  ;;  %v704_v46 = vadd.f32 %v695_v39, %v589_v25 }
 0x309   :  { %v705_v43 = vadd.f32 %v697_v40, %v590_v17  ;;  %v706_v44 = vadd.f32 %v698_v41, %v591_v19  ;;  %v707_v45 = vadd.f32 %v699_v42, %v592_v26 }
 0x30b   :  { %v712_v47 = vrot.slane %v705_v43, 7  ;;  %v714_v48 = vrot.slane %v706_v44, 6  ;;  %v716_v50 = vrot.slane %v707_v45, 5 }
 0x30d   :  { %v713_v49 = vsel %vm609_vm5, %v712_v47, %v704_v46 }
 0x30e   :  { %v715_v51 = vsel %vm612_vm6, %v714_v48, %v713_v49 }
 0x30f   :  { %v717_v52 = vsel %vm615_vm7, %v716_v50, %v715_v51 }
 0x310   :  { %720 = vst.msk [vmem:[#allocation2] sm:$0xf] %vm719_vm8, %v717_v52 }
 0x311   :  { %932 = shalt.err (!%p929_p4)
}
 0x312   :  { %s933_s21 = scalar_lea.hbm %s1136_s7, 64 }
 0x313   :  { %p934_p5 = scmp.ne.s32.totalorder %s1136_s7, %s933_s21  ;;  %p937_p6 = scmp.lt.u32.totalorder %s933_s21, %s1136_s7 }
 0x315   :  { %p939_p7 = pnand %p937_p6, %p934_p5 }
 0x317   :  { %942 = shalt.err (!%p939_p7)
}
 0x318   :  { %730 = dma.vmem_to_hbm [thread:$0]  %s728_s17, 64, %s1136_s7, [#allocation3]  }
 0x319   :  { %943 = dma.done.wait [#allocation3], 64  }
 0x31a   :  { %944 = vsyncadd [#allocation3], 4294967232 }
 0x31b   :  { %734 = vsyncpa [#allocation3], 1 }

</bundles_post_ra>
